<compile_context>
chip_gen: v7x
topology: tpu7x:2x2x1
jax: 0.10.0
libtpu: 0.0.40
codegen_flags: <defaults>
</compile_context>

<pallas_src>
import jax
import jax.numpy as jnp
from jax.experimental import pallas as pl
from jax.experimental.pallas import tpu as pltpu

NUM_FEATURES = 12
HIDDEN_DIM = 30
LANE = 128


def mlp_kernel(x_ref, w1_ref, b1_ref, w2_ref, b2_ref, w3_ref, b3_ref, o_ref):
    # Transposed ("batch-on-lanes") layout: every matmul has N = TILE_B (lane-dense).
    x = x_ref[...]                                                     # (12, TILE_B)

    # lin1 + relu   (dropout1 == identity at inference)
    h1 = jnp.dot(w1_ref[...], x, preferred_element_type=jnp.float32) + b1_ref[...]
    h1 = jnp.maximum(h1, 0.0)                                          # (30, TILE_B)

    # lin2 + relu   (dropout2 == identity at inference)
    h2 = jnp.dot(w2_ref[...], h1, preferred_element_type=jnp.float32) + b2_ref[...]
    h2 = jnp.maximum(h2, 0.0)                                          # (30, TILE_B)

    # lin3 + sigmoid
    h3 = jnp.dot(w3_ref[...], h2, preferred_element_type=jnp.float32) + b3_ref[...]
    o_ref[...] = jax.nn.sigmoid(h3).astype(o_ref.dtype)                # (1, TILE_B)
    # TODO(synk): training-mode dropout (p=0.2) would need pltpu.prng_seed/prng_random_bits.


def _forward_ref(x, params):
    """Plain-JAX reference (and fast path for tiny batches)."""
    w1, b1, w2, b2, w3, b3 = params
    h = jnp.maximum(x @ w1 + b1, 0.0)
    h = jnp.maximum(h @ w2 + b2, 0.0)
    return jax.nn.sigmoid(h @ w3 + b3)


def neural_network_forward(x, params, *, tile_b=2048, min_pallas_batch=512,
                           force_pallas=False):
    """x: [B, NUM_FEATURES] -> [B, 1].  Weights in the [in, out] convention."""
    w1, b1, w2, b2, w3, b3 = params
    B = x.shape[0]

    if B < min_pallas_batch and not force_pallas:
        # pallas_call launch + DMA setup dominates at tiny B; let XLA fuse it.
        return _forward_ref(x, params)

    # Lane-dense batch tile: multiple of 128, no larger than needed to cover B.
    tile = min(tile_b, pl.cdiv(B, LANE) * LANE)
    b_pad = pl.cdiv(B, tile) * tile
    grid = (b_pad // tile,)

    # Transpose so batch is the last (lane) dimension; zero-pad the batch tail.
    xt = jnp.zeros((NUM_FEATURES, b_pad), x.dtype).at[:, :B].set(x.T)
    w1t, w2t, w3t = w1.T, w2.T, w3.T          # (30,12), (30,30), (1,30)
    b1t, b2t, b3t = b1.T, b2.T, b3.T          # (30,1),  (30,1),  (1,1)

    # Constant block index -> weights/biases stay resident in VMEM across tiles.
    const = lambda a: pl.BlockSpec(a.shape, lambda i: (0, 0))

    out_t = pl.pallas_call(
        mlp_kernel,
        out_shape=jax.ShapeDtypeStruct((1, b_pad), x.dtype),
        grid=grid,
        in_specs=[
            pl.BlockSpec((NUM_FEATURES, tile), lambda i: (0, i)),      # x tile streams
            const(w1t), const(b1t),
            const(w2t), const(b2t),
            const(w3t), const(b3t),
        ],
        out_specs=pl.BlockSpec((1, tile), lambda i: (0, i)),           # lane-dense store
        compiler_params=pltpu.CompilerParams(
            dimension_semantics=("parallel",)),                        # megacore on v7x
    )(xt, w1t, b1t, w2t, b2t, w3t, b3t)

    # Back to the PyTorch (B, 1) layout; padding columns are dropped.
    return out_t[:, :B].T


def init_params(key):
    # Deterministic init mimicking nn.Linear's uniform(-1/sqrt(fan_in), 1/sqrt(fan_in)).
    keys = jax.random.split(key, 6)

    def linear_init(kw, kb, fan_in, fan_out):
        bound = 1.0 / jnp.sqrt(float(fan_in))
        w = jax.random.uniform(kw, (fan_in, fan_out), jnp.float32, -bound, bound)
        b = jax.random.uniform(kb, (1, fan_out), jnp.float32, -bound, bound)
        return w, b

    w1, b1 = linear_init(keys[0], keys[1], NUM_FEATURES, HIDDEN_DIM)
    w2, b2 = linear_init(keys[2], keys[3], HIDDEN_DIM, HIDDEN_DIM)
    w3, b3 = linear_init(keys[4], keys[5], HIDDEN_DIM, 1)
    return (w1, b1, w2, b2, w3, b3)


if __name__ == "__main__":
    key = jax.random.PRNGKey(0)
    pkey, xkey1, xkey2 = jax.random.split(key, 3)
    params = init_params(pkey)

    # Case 1: tiny batch (B=8) — force the Pallas path to exercise the kernel.
    batch = 8
    x = jax.random.normal(xkey1, (batch, NUM_FEATURES), dtype=jnp.float32)
    out = neural_network_forward(x, params, force_pallas=True)
    out = jax.block_until_ready(out)
    ref = _forward_ref(x, params)
    assert out.shape == (batch, 1)
    assert jnp.allclose(out, ref, atol=1e-5, rtol=1e-5)

    # Case 2: small multi-tile batch (B=300, tile=128 -> grid of 3 with padding).
    batch2 = 300
    x2 = jax.random.normal(xkey2, (batch2, NUM_FEATURES), dtype=jnp.float32)
    out2 = neural_network_forward(x2, params, tile_b=128, force_pallas=True)
    out2 = jax.block_until_ready(out2)
    ref2 = _forward_ref(x2, params)
    assert out2.shape == (batch2, 1)
    assert jnp.allclose(out2, ref2, atol=1e-5, rtol=1e-5)

    print("KERNEL_OK")
</pallas_src>

<mosaic_0001>
module attributes {stable_mosaic.version = 11 : i64} {
  func.func @mlp_kernel(%arg0: i32, %arg1: memref<12x128xf32, #tpu.memory_space<vmem>>, %arg2: memref<30x12xf32, #tpu.memory_space<vmem>>, %arg3: memref<30x1xf32, #tpu.memory_space<vmem>>, %arg4: memref<30x30xf32, #tpu.memory_space<vmem>>, %arg5: memref<30x1xf32, #tpu.memory_space<vmem>>, %arg6: memref<1x30xf32, #tpu.memory_space<vmem>>, %arg7: memref<1x1xf32, #tpu.memory_space<vmem>>, %arg8: memref<1x128xf32, #tpu.memory_space<vmem>>) attributes {dimension_semantics = [#tpu.dimension_semantics<parallel>], iteration_bounds = array<i64: 1>, scalar_prefetch = 0 : i64, scratch_operands = 0 : i64, tpu.core_type = #tpu.core_type<tc>, window_params = [{transform_indices = @transform_0, window_bounds = array<i64: 12, 128>}, {pipeline_mode = #tpu.pipeline_mode<synchronous>, transform_indices = @transform_1, window_bounds = array<i64: 30, 12>}, {pipeline_mode = #tpu.pipeline_mode<synchronous>, transform_indices = @transform_2, window_bounds = array<i64: 30, 1>}, {pipeline_mode = #tpu.pipeline_mode<synchronous>, transform_indices = @transform_3, window_bounds = array<i64: 30, 30>}, {pipeline_mode = #tpu.pipeline_mode<synchronous>, transform_indices = @transform_4, window_bounds = array<i64: 30, 1>}, {pipeline_mode = #tpu.pipeline_mode<synchronous>, transform_indices = @transform_5, window_bounds = array<i64: 1, 30>}, {pipeline_mode = #tpu.pipeline_mode<synchronous>, transform_indices = @transform_6, window_bounds = array<i64: 1, 1>}, {transform_indices = @transform_7, window_bounds = array<i64: 1, 128>}]} {
    %c0 = arith.constant 0 : index
    %c0_0 = arith.constant 0 : index
    %0 = vector.load %arg1[%c0, %c0_0] : memref<12x128xf32, #tpu.memory_space<vmem>>, vector<12x128xf32>
    %c0_1 = arith.constant 0 : index
    %c0_2 = arith.constant 0 : index
    %1 = vector.load %arg2[%c0_1, %c0_2] : memref<30x12xf32, #tpu.memory_space<vmem>>, vector<30x12xf32>
    %cst = arith.constant dense<0.000000e+00> : vector<30x128xf32>
    %2 = tpu.matmul %1, %0, %cst {dimension_numbers = #tpu.dot_dimension_numbers<[1], [0], [0], [1], [0, 0, 1, 1], [], []>} : vector<30x12xf32>, vector<12x128xf32>, vector<30x128xf32> -> vector<30x128xf32>
    %c0_3 = arith.constant 0 : index
    %c0_4 = arith.constant 0 : index
    %3 = vector.load %arg3[%c0_3, %c0_4] : memref<30x1xf32, #tpu.memory_space<vmem>>, vector<30x1xf32>
    %4 = vector.broadcast %3 : vector<30x1xf32> to vector<30x128xf32>
    %5 = arith.addf %2, %4 : vector<30x128xf32>
    %cst_5 = arith.constant 0.000000e+00 : f32
    %6 = vector.broadcast %cst_5 : f32 to vector<30x128xf32>
    %7 = arith.maximumf %5, %6 : vector<30x128xf32>
    %c0_6 = arith.constant 0 : index
    %c0_7 = arith.constant 0 : index
    %8 = vector.load %arg4[%c0_6, %c0_7] : memref<30x30xf32, #tpu.memory_space<vmem>>, vector<30x30xf32>
    %cst_8 = arith.constant dense<0.000000e+00> : vector<30x128xf32>
    %9 = tpu.matmul %8, %7, %cst_8 {dimension_numbers = #tpu.dot_dimension_numbers<[1], [0], [0], [1], [0, 0, 1, 1], [], []>} : vector<30x30xf32>, vector<30x128xf32>, vector<30x128xf32> -> vector<30x128xf32>
    %c0_9 = arith.constant 0 : index
    %c0_10 = arith.constant 0 : index
    %10 = vector.load %arg5[%c0_9, %c0_10] : memref<30x1xf32, #tpu.memory_space<vmem>>, vector<30x1xf32>
    %11 = vector.broadcast %10 : vector<30x1xf32> to vector<30x128xf32>
    %12 = arith.addf %9, %11 : vector<30x128xf32>
    %cst_11 = arith.constant 0.000000e+00 : f32
    %13 = vector.broadcast %cst_11 : f32 to vector<30x128xf32>
    %14 = arith.maximumf %12, %13 : vector<30x128xf32>
    %c0_12 = arith.constant 0 : index
    %c0_13 = arith.constant 0 : index
    %15 = vector.load %arg6[%c0_12, %c0_13] : memref<1x30xf32, #tpu.memory_space<vmem>>, vector<1x30xf32>
    %cst_14 = arith.constant dense<0.000000e+00> : vector<1x128xf32>
    %16 = tpu.matmul %15, %14, %cst_14 {dimension_numbers = #tpu.dot_dimension_numbers<[1], [0], [0], [1], [0, 0, 1, 1], [], []>} : vector<1x30xf32>, vector<30x128xf32>, vector<1x128xf32> -> vector<1x128xf32>
    %c0_15 = arith.constant 0 : index
    %c0_16 = arith.constant 0 : index
    %17 = vector.load %arg7[%c0_15, %c0_16] : memref<1x1xf32, #tpu.memory_space<vmem>>, vector<1x1xf32>
    %18 = vector.broadcast %17 : vector<1x1xf32> to vector<1x128xf32>
    %19 = arith.addf %16, %18 : vector<1x128xf32>
    %20 = arith.negf %19 : vector<1x128xf32>
    %21 = math.exp %20 : vector<1x128xf32>
    %cst_17 = arith.constant 1.000000e+00 : f32
    %22 = vector.broadcast %cst_17 : f32 to vector<1x128xf32>
    %23 = arith.addf %22, %21 : vector<1x128xf32>
    %24 = arith.divf %22, %23 : vector<1x128xf32>
    %c0_18 = arith.constant 0 : index
    %c0_19 = arith.constant 0 : index
    %25 = vector.load %arg8[%c0_18, %c0_19] : memref<1x128xf32, #tpu.memory_space<vmem>>, vector<1x128xf32>
    tpu.vector_store %arg8[%c0_18, %c0_19], %24 {strides = array<i32>} : memref<1x128xf32, #tpu.memory_space<vmem>>, vector<1x128xf32>,
    return
  }
  func.func @transform_0(%arg0: i32) -> (i32, i32) {
    %c0_i32 = arith.constant 0 : i32
    %c0_i32_0 = arith.constant 0 : i32
    return %c0_i32, %arg0 : i32, i32
  }
  func.func @transform_1(%arg0: i32) -> (i32, i32) {
    %c0_i32 = arith.constant 0 : i32
    %c0_i32_0 = arith.constant 0 : i32
    %c0_i32_1 = arith.constant 0 : i32
    return %c0_i32, %c0_i32_0 : i32, i32
  }
  func.func @transform_2(%arg0: i32) -> (i32, i32) {
    %c0_i32 = arith.constant 0 : i32
    %c0_i32_0 = arith.constant 0 : i32
    %c0_i32_1 = arith.constant 0 : i32
    return %c0_i32, %c0_i32_0 : i32, i32
  }
  func.func @transform_3(%arg0: i32) -> (i32, i32) {
    %c0_i32 = arith.constant 0 : i32
    %c0_i32_0 = arith.constant 0 : i32
    %c0_i32_1 = arith.constant 0 : i32
    return %c0_i32, %c0_i32_0 : i32, i32
  }
  func.func @transform_4(%arg0: i32) -> (i32, i32) {
    %c0_i32 = arith.constant 0 : i32
    %c0_i32_0 = arith.constant 0 : i32
    %c0_i32_1 = arith.constant 0 : i32
    return %c0_i32, %c0_i32_0 : i32, i32
  }
  func.func @transform_5(%arg0: i32) -> (i32, i32) {
    %c0_i32 = arith.constant 0 : i32
    %c0_i32_0 = arith.constant 0 : i32
    %c0_i32_1 = arith.constant 0 : i32
    return %c0_i32, %c0_i32_0 : i32, i32
  }
  func.func @transform_6(%arg0: i32) -> (i32, i32) {
    %c0_i32 = arith.constant 0 : i32
    %c0_i32_0 = arith.constant 0 : i32
    %c0_i32_1 = arith.constant 0 : i32
    return %c0_i32, %c0_i32_0 : i32, i32
  }
  func.func @transform_7(%arg0: i32) -> (i32, i32) {
    %c0_i32 = arith.constant 0 : i32
    %c0_i32_0 = arith.constant 0 : i32
    return %c0_i32, %arg0 : i32, i32
  }
}

</mosaic_0001>

<bundles_post_ra>
// kernel: tpu_custom_call.1
= control target key start
LH: loop header
LB: loop body
LE: loop exit
PB: predicated region body
PF: predicated region fallthrough
CT: control target
= control target key end

     0   :  { %s672_s0 = inlined_call_operand.vmem [shape: f32[12,128], index: 0, kind: input, shape index: {}]   ;;  %s673_s1 = inlined_call_operand.vmem [shape: f32[30,12], index: 1, kind: input, shape index: {}]   ;;  %s674_s2 = inlined_call_operand.vmem [shape: f32[30,1], index: 2, kind: input, shape index: {}]   ;;  %s675_s3 = inlined_call_operand.vmem [shape: f32[30,30], index: 3, kind: input, shape index: {}]   ;;  %s676_s4 = inlined_call_operand.vmem [shape: f32[30,1], index: 4, kind: input, shape index: {}]   ;;  %s677_s5 = inlined_call_operand.vmem [shape: f32[1,30], index: 5, kind: input, shape index: {}]   ;;  %s678_s6 = inlined_call_operand.<no memory space> [shape: f32[1,1], index: 6, kind: input, shape index: {}]   ;;  %s679_s7 = inlined_call_operand.hbm [shape: f32[1,128], index: 7, kind: output, shape index: {}]  }
   0x1   :  { %v12_v0 = vstv %s678_s6 }
   0x2   :  { %13 = vst [vmem:[#allocation2] sm:$0x1] %v12_v0 }
   0x3   :  { %v29_v1 = vld [vmem:[%s672_s0] sm:$0xff]  ;;  %v30_v2 = vld [vmem:[%s672_s0 + $0x8] sm:$0xf]  ;;  %vm72_vm0 = vcmask 1043456   ;;  %vm533_vm1 = vmmov 1   ;;  %vm59_vm3 = vcmask 97280  }
   0x4   :  { %v474_v3 = vpack.c.bf16 %v30_v2, %v29_v1  ;;  %vm475_vm2 = vmpackc.low %vm72_vm0, %vm533_vm1  ;;  %v31_v4 = vld [vmem:[%s673_s1] sm:$0xff]  ;;  %v534_v5 = vmov 0   ;;  %v37_v7 = vld [vmem:[%s674_s2 + $0x10] sm:$0xff] }
   0x5   :  { %443 = vmatprep.mubr.msk.f32.mxu0 %vm59_vm3, %v31_v4  ;;  %503 = vset.pattern.permute.xlu0 %v534_v5  ;;  %v35_v6 = vld [vmem:[%s674_s2] sm:$0xff]  ;;  %v32_v8 = vld [vmem:[%s673_s1 + $0x8] sm:$0xff]  ;;  %v33_v9 = vld [vmem:[%s673_s1 + $0x10] sm:$0xff] }
   0x6   :  { %476 = vmatprep.subr.msk.bf16.mxu0 %vm475_vm2, %v474_v3  ;;  %504 = vset.pattern.permute.xlu1 %v534_v5  ;;  %v36_v10 = vld [vmem:[%s674_s2 + $0x8] sm:$0xff]  ;;  %v38_v11 = vld [vmem:[%s674_s2 + $0x18] sm:$0x3f] }
   0x7   :  { %479 = vmatpush3.bf16.msk.msra.mxu0 %vm475_vm2, %v474_v3  ;;  %41 = vperm.xlu0 %503, %v35_v6  }
   0x8   :  { %51 = vperm.xlu1 %504, %v37_v7  }
   0x9   :  { %14 = vsyncpa [#allocation4], 0  ;;  %v34_v12 = vld [vmem:[%s673_s1 + $0x18] sm:$0x3f]  ;;  %v169_v13 = vld [vmem:[%s676_s4] sm:$0xff]  ;;  %vm193_vm4 = vcmask 244736   ;;  %v306_v62 = vlaneseq }
   0xa   :  { %444 = vmatmul.mubr.msk.f32.vlgmr.msra.gmra.mrb[0].mxu0 %vm59_vm3, %v32_v8  ;;  %v170_v14 = vld [vmem:[%s676_s4 + $0x8] sm:$0xff]  ;;  %v171_v15 = vld [vmem:[%s676_s4 + $0x10] sm:$0xff]  ;;  %v172_v16 = vld [vmem:[%s676_s4 + $0x18] sm:$0x3f]  ;;  %vm206_vm5 = vcmask 1045504   ;;  %v535_v41 = vmov 0.0|0.0  }
   0xb   :  { %446 = vmatprep.mubr.msk.f32.mxu0 %vm59_vm3, %v33_v9  ;;  %46 = vperm.xlu0 %503, %v36_v10   ;;  %v300_v17 = vld [vmem:[#allocation2] sm:$0x1]  ;;  %vm634_vm6 = vmpackc.low %vm206_vm5, %vm533_vm1  ;;  %v166_v38 = vld [vmem:[%s675_s3 + $0x8] sm:$0xff]  ;;  %vm536_vm7 = vmmov 0   ;;  %v537_v42 = vmov 0.0   ;;  %v307_v63 = vshrl.u32 %v306_v62, 7 }
   0xc   :  { %56 = vperm.xlu1 %504, %v38_v11   ;;  %v165_v18 = vld [vmem:[%s675_s3] sm:$0xff]  ;;  %v167_v39 = vld [vmem:[%s675_s3 + $0x10] sm:$0xff]  ;;  %v168_v40 = vld [vmem:[%s675_s3 + $0x18] sm:$0x3f]  ;;  %490 = vmatprep.subr.bf16.mxu0 %v535_v41  ;;  %s538_s10 = smov [#allocation3]  }
   0xd   :  { %457 = vmatprep.mubr.msk.f32.mxu1 %vm193_vm4, %v165_v18  ;;  %v299_v61 = vld [vmem:[%s677_s5] sm:$0x1]  ;;  %v308_v0 = vsub.s32 0, %v307_v63  ;;  %s399_s11 = sshll.u32 %s538_s10, 4  ;;  %s400_s11 = int_to_ptr.vmem [resolvable:$true] %s399_s11 }
   0xe   :  { %447 = vmatmul.mubr.msk.f32.gmra.mrb[2].mxu0 %vm59_vm3, %v34_v12  ;;  %s509_s5 = scalar_lea.vmem %s400_s11, 16  ;;  %s513_s12 = scalar_lea.vmem %s400_s11, 32 }
   0xf   :  { %175 = vperm.xlu0 %503, %v169_v13   ;;  %471 = vmatprep.mubr.msk.f32.mxu0 %vm536_vm7, %v537_v42  ;;  %p510_p0 = scmp.ne.s32.totalorder %s400_s11, %s509_s5  ;;  %p514_p1 = scmp.lt.s32.totalorder %s400_s11, %s400_s11 }
  0x10   :  { %180 = vperm.xlu1 %504, %v170_v14   ;;  %p515_p2 = scmp.lt.s32.totalorder %s513_s12, %s509_s5 }
  0x12   :  { %p516_p3 = por %p515_p2, %p514_p1 }
  0x13   :  { %185 = vperm.xlu0 %503, %v171_v15  }
  0x14   :  { %190 = vperm.xlu1 %504, %v172_v16   ;;  %p517_p4 = pnand %p516_p3, %p510_p0 }
  0x17   :  { %303 = vperm.xlu0 %503, %v300_v17  }
  0x86   :  { %v42_v19 = vpop.permute.xlu0 %41 }
  0x87   :  { %v52_v20 = vpop.permute.xlu1 %51 }
  0x8a   :  { %v47_v21 = vpop.permute.xlu0 %46 }
  0x8b   :  { %v57_v27 = vpop.permute.xlu1 %56 }
  0x8e   :  { %v176_v44 = vpop.permute.xlu0 %175 }
  0x8f   :  { %v181_v43 = vpop.permute.xlu1 %180 }
  0x92   :  { %v186_v53 = vpop.permute.xlu0 %185 }
  0x93   :  { %v191_v50 = vpop.permute.xlu1 %190 }
  0x96   :  { %v304_v1 = vpop.permute.xlu0 %303 }
  0x97   :  { %v309_v2 = vrot.slane %v304_v1, %v308_v0 }
  0xdd   :  { %v445_v22 = vpop.f32.mrb[0].mxu0 }
  0xde   :  { %v148_v23 = vadd.f32 %v445_v22, %v47_v21  ;;  %v142_v24 = vpop.f32.mrb[1].mxu0 }
  0xdf   :  { %v143_v25 = vadd.f32 %v142_v24, %v42_v19 }
  0xe0   :  { %v162_v26 = vmax.f32 %v148_v23, 0.0 }
  0xe1   :  { %v161_v28 = vmax.f32 %v143_v25, 0.0  ;;  %v448_v29 = vpop.f32.mrb[2].mxu0 }
  0xe2   :  { %v158_v30 = vadd.f32 %v448_v29, %v57_v27  ;;  %v152_v31 = vpop.f32.mrb[3].mxu0 }
  0xe3   :  { %v153_v32 = vadd.f32 %v152_v31, %v52_v20  ;;  %v480_v33 = vpack.c.bf16 %v162_v26, %v161_v28 }
  0xe4   :  { %v164_v34 = vmax.f32 %v158_v30, 0.0 }
  0xe5   :  { %v163_v35 = vmax.f32 %v153_v32, 0.0  ;;  %481 = vmatprep.subr.bf16.mxu1 %v480_v33 }
  0xe6   :  { %483 = vmatpush3.bf16.msra.mxu1 %v480_v33 }
  0xe7   :  { %v484_v37 = vpack.c.bf16 %v164_v34, %v163_v35 }
  0xe9   :  { %486 = vmatprep.subr.msk.bf16.mxu1 %vm634_vm6, %v484_v37 }
  0xea   :  { %489 = vmatpush3.bf16.msk.msra.mxu1 %vm634_vm6, %v484_v37 }
  0xed   :  { %458 = vmatmul.mubr.msk.f32.vlgmr.msra.gmra.mrb[0].mxu1 %vm193_vm4, %v166_v38 }
  0xee   :  { %460 = vmatprep.mubr.msk.f32.mxu1 %vm193_vm4, %v167_v39 }
  0xf1   :  { %461 = vmatmul.mubr.msk.f32.gmra.mrb[2].mxu1 %vm193_vm4, %v168_v40 }
 0x1c0   :  { %v459_v45 = vpop.f32.mrb[0].mxu1 }
 0x1c1   :  { %v282_v46 = vadd.f32 %v459_v45, %v181_v43  ;;  %v276_v47 = vpop.f32.mrb[1].mxu1 }
 0x1c2   :  { %v277_v48 = vadd.f32 %v276_v47, %v176_v44 }
 0x1c3   :  { %v296_v49 = vmax.f32 %v282_v46, 0.0 }
 0x1c4   :  { %v295_v51 = vmax.f32 %v277_v48, 0.0  ;;  %v462_v52 = vpop.f32.mrb[2].mxu1 }
 0x1c5   :  { %v292_v54 = vadd.f32 %v462_v52, %v191_v50  ;;  %v286_v55 = vpop.f32.mrb[3].mxu1 }
 0x1c6   :  { %v491_v56 = vpack.c.bf16 %v296_v49, %v295_v51  ;;  %v287_v57 = vadd.f32 %v286_v55, %v186_v53 }
 0x1c7   :  { %v298_v58 = vmax.f32 %v292_v54, 0.0 }
 0x1c8   :  { %v297_v59 = vmax.f32 %v287_v57, 0.0  ;;  %492 = vmatpush3.bf16.msra.mxu0 %v491_v56 }
 0x1c9   :  { %493 = vmatprep.subr.bf16.mxu0 %v535_v41 }
 0x1ca   :  { %v494_v60 = vpack.c.bf16 %v298_v58, %v297_v59 }
 0x1cc   :  { %496 = vmatpush3.bf16.msk.msra.mxu0 %vm634_vm6, %v494_v60 }
 0x1cf   :  { %472 = vmatmul.mubr.msk.f32.vlgmr.msra.gmra.mrb[4].mxu0 %vm193_vm4, %v299_v61 }
 0x2a2   :  { %v382_v3 = vpop.f32.mrb[4].mxu0 }
 0x2a3   :  { %v383_v4 = vadd.f32 %v382_v3, %v309_v2  ;;  %v473_v5 = vpop.f32.mrb[5].mxu0 }
 0x2a5   :  { %v419_v6 = vmul.f32 -1.442695, %v383_v4 }
 0x2a7   :  { %505 = vpow2.f32 %v419_v6 }
 0x2b1   :  { %v506_v7 = vpop.eup %505 }
 0x2b2   :  { %v389_v8 = vadd.f32 1.0, %v506_v7 }
 0x2b4   :  { %507 = vrcp.f32 %v389_v8 }
 0x2be   :  { %v508_v9 = vpop.eup %507 }
 0x2bf   :  { %392 = vst [vmem:[#allocation3] sm:$0x1] %v508_v9 }
 0x2c0   :  { %520 = shalt.err (!%p517_p4)
}
 0x2c1   :  { %s521_s15 = scalar_lea.hbm %s679_s7, 16 }
 0x2c2   :  { %p522_p5 = scmp.ne.s32.totalorder %s679_s7, %s521_s15  ;;  %p525_p6 = scmp.lt.u32.totalorder %s521_s15, %s679_s7 }
 0x2c4   :  { %p527_p7 = pnand %p525_p6, %p522_p5 }
 0x2c6   :  { %530 = shalt.err (!%p527_p7)
}
 0x2c7   :  { %402 = dma.vmem_to_hbm [thread:$0]  %s400_s11, 16, %s679_s7, [#allocation4]  }
 0x2c8   :  { %531 = dma.done.wait [#allocation4], 16  }
 0x2c9   :  { %532 = vsyncadd [#allocation4], 4294967280 }
 0x2ca   :  { %406 = vsyncpa [#allocation4], 1 }

</bundles_post_ra>
